<compile_context>
chip_gen: v5e
topology: v5e:2x2
jax: 0.10.0
libtpu: 0.0.40
codegen_flags: <defaults>
</compile_context>

<pallas_src>
import functools

import numpy as np
import jax
import jax.numpy as jnp
from jax.experimental import pallas as pl
from jax.experimental.pallas import tpu as pltpu


def _round_up(x, m):
    return (x + m - 1) // m * m


def _vmem_config():
    """Generation-aware (vmem_limit_bytes, per-step tile budget)."""
    try:
        cap = int(pltpu.get_tpu_info().vmem_capacity_bytes)
    except Exception:
        cap = 64 * 1024 * 1024  # conservative: v7x physical VMEM
    limit = min(int(cap * 0.75), 96 * 1024 * 1024)   # v5e/v6e: 96 MiB, v7x: 48 MiB
    tile_budget = int(limit * 0.6)                    # leave headroom for constants/etc.
    return limit, tile_budget


def _pick_spatial_tile(s_per, nh, ck, p2, budget_bytes):
    """Largest divisor of s_per (multiple of 8, or s_per itself) whose
    per-step VMEM footprint (double-buffered IO tiles + compiler temps) fits."""
    lane = 128

    def rpad(w):
        return _round_up(max(int(w), 1), lane)

    # per spatial row (f32): 2x att dbuf + 2x cos dbuf + ~6 (row, ck) temporaries
    bytes_per_row = 4 * (2 * rpad(nh) + 2 * rpad(p2) + 6 * rpad(ck))
    cands = [d for d in range(s_per, 0, -1)
             if s_per % d == 0 and (d % 8 == 0 or d == s_per)]
    for d in cands:
        if d * bytes_per_row <= budget_bytes:
            return d
    return cands[-1]


# ----------------------------------------------------------------------------
# Pallas kernel: fused add_on convs (both branches) -> per-branch F.normalize
# -> cosine conv -> relu -> store tile -> running spatial max.
# ----------------------------------------------------------------------------
def stprotopnet_kernel(att_ref, w12_ref, b12_ref, pn_ref,
                       cos_ref, act_ref, *, proto_dim):
    """One (batch, spatial_split, spatial_tile) grid step.

    att_ref : (st, NH)   raw attention rows (norm_img folded into w12/b12)
    w12_ref : (NH, CK)   fused add_on convs, both branches, lane-padded
    b12_ref : (1, CK)
    pn_ref  : (CK, P2)   block-diagonal L2-normalized prototypes (P2 unpadded)
    cos_ref : (st, P2)   relu(cosine similarity) tile (dominant HBM write)
    act_ref : (1, P2)    resident running max for this (batch, split)
    """
    k = pl.program_id(2)                               # spatial reduction step

    # Fused add_on 1x1 convs of both branches in one MXU pass: (st, CK).
    h = jnp.dot(att_ref[...], w12_ref[...], preferred_element_type=jnp.float32)
    h = h + b12_ref[...]

    # Per-branch F.normalize over channels (branch picked by a column mask;
    # rsqrt uses the EUP slot).  Zero-padded columns contribute nothing.
    col = jax.lax.broadcasted_iota(jnp.int32, h.shape, 1)
    is_t = col < proto_dim
    sq = h * h
    ss_t = jnp.sum(jnp.where(is_t, sq, 0.0), axis=-1, keepdims=True)
    ss_s = jnp.sum(jnp.where(is_t, 0.0, sq), axis=-1, keepdims=True)
    eps2 = 1e-24                                       # (F.normalize eps=1e-12)^2
    inv_t = jax.lax.rsqrt(jnp.maximum(ss_t, eps2))
    inv_s = jax.lax.rsqrt(jnp.maximum(ss_s, eps2))
    xn = h * jnp.where(is_t, inv_t, inv_s)

    # Cosine "convolution" against the block-diagonal pre-normalized prototype
    # matrix, then relu; stored at the TRUE width (no lane-padding inflation of
    # the biggest HBM write).
    cos = jnp.maximum(
        jnp.dot(xn, pn_ref[...], preferred_element_type=jnp.float32), 0.0)
    cos_ref[...] = cos

    # Global max pooling, accumulated across the trailing "arbitrary" axis
    # into the resident per-(batch, split) output block.
    tile_max = jnp.max(cos, axis=0, keepdims=True)

    @pl.when(k == 0)
    def _():
        act_ref[...] = tile_max

    @pl.when(k > 0)
    def _():
        act_ref[...] = jnp.maximum(act_ref[...], tile_max)


# ----------------------------------------------------------------------------
# JAX glue
# ----------------------------------------------------------------------------
def get_attention_standin(x, head_mix):
    # TODO(synk): the frozen DINO ViT-S/8 backbone (torch.hub 'dino_vits8',
    # get_last_selfattention) has no clean Pallas equivalent; deterministic
    # stand-in producing same-shaped (B, 6, H//8, W//8) attention maps.
    b, c, h, w = x.shape
    hf, wf = h // 8, w // 8
    patches = x.reshape(b, c, hf, 8, wf, 8).mean(axis=(3, 5))      # (B, 3, Hf, Wf)
    return jnp.einsum("hc,bcij->bhij", head_mix, patches)          # (B, 6, Hf, Wf)


def stprotopnet_forward(att, params, *, spatial_tile=None, spatial_splits=None,
                        nchw_cos=False):
    """att: (B, 6, Hf, Wf) attention maps; returns the module's 3 output pairs.

    cos maps are returned NHWC by default (nchw_cos=False) to avoid a second
    full HBM read+write of the largest tensor just for layout.
    """
    b, nh, hf, wf = att.shape
    s = hf * wf
    p = params
    proto_dim, num_protos = p["proto_t"].shape
    num_classes = p["last_w_t"].shape[1]
    p2 = 2 * num_protos                       # true (unpadded) cos width
    ck = _round_up(2 * proto_dim, 128)        # internal lane-dense channel width
    hi = jax.lax.Precision.HIGHEST

    # small layout change so spatial rows are contiguous (tiny vs cos traffic)
    att_rows = jnp.transpose(att, (0, 2, 3, 1)).reshape(b, s, nh)  # (B, S, 6)

    # ---- tiny wrapper-side precompute (all loop-invariant work hoisted) ----
    # norm_img: one global min/max over the whole batch tensor (as in the
    # PyTorch module).  Folded exactly into the fused convs below; eps guards
    # a constant attention map.
    mn = jnp.min(att)
    inv = 1.0 / jnp.maximum(jnp.max(att) - mn, 1e-12)

    def fuse(w1, b1, w2, b2):                 # two linear 1x1 convs -> one
        return (jnp.matmul(w1, w2, precision=hi),
                jnp.matmul(b1, w2, precision=hi) + b2)

    w12_t, b12_t = fuse(p["w1_t"], p["b1_t"], p["w2_t"], p["b2_t"])
    w12_s, b12_s = fuse(p["w1_s"], p["b1_s"], p["w2_s"], p["b2_s"])
    w12 = jnp.concatenate([w12_t, w12_s], axis=1)                  # (6, 2P)
    b12 = jnp.concatenate([b12_t, b12_s], axis=1)                  # (1, 2P)

    # fold norm_img:  ((att-mn)*inv) @ w12 + b12 == att @ (inv*w12) + b12'
    b12 = b12 - mn * inv * jnp.sum(w12, axis=0, keepdims=True)
    w12 = inv * w12

    # lane-pad the INTERNAL channel axis only (zero columns -> numerically inert)
    w12 = jnp.pad(w12, ((0, 0), (0, ck - 2 * proto_dim))).astype(jnp.float32)
    b12 = jnp.pad(b12, ((0, 0), (0, ck - 2 * proto_dim))).astype(jnp.float32)

    # block-diagonal L2-normalized prototypes (padded rows are zero)
    def l2n(v):
        return v / jnp.maximum(jnp.sqrt(jnp.sum(v * v, axis=0, keepdims=True)),
                               1e-12)
    pn = jnp.zeros((ck, p2), jnp.float32)
    pn = pn.at[:proto_dim, :num_protos].set(l2n(p["proto_t"]))
    pn = pn.at[proto_dim:2 * proto_dim, num_protos:].set(l2n(p["proto_s"]))

    # ---- grid / tiling -----------------------------------------------------
    if spatial_splits is None:
        # with batch < 2, split the spatial axis so both v7x TCs have work
        spatial_splits = 1 if b >= 2 else 2
    g = spatial_splits if (spatial_splits >= 1 and s % spatial_splits == 0) else 1
    s_per = s // g

    vmem_limit, tile_budget = _vmem_config()
    st = (spatial_tile if spatial_tile is not None
          else _pick_spatial_tile(s_per, nh, ck, p2, tile_budget))
    assert s_per % st == 0 and (st % 8 == 0 or st == s_per), \
        "spatial_tile must divide Hf*Wf/splits and be 8-aligned (or full)"
    ns = s_per // st
    grid = (b, g, ns)

    kernel = functools.partial(stprotopnet_kernel, proto_dim=proto_dim)

    in_specs = [
        pl.BlockSpec((None, st, nh), lambda bi, gi, ki, _ns=ns: (bi, gi * _ns + ki, 0)),
        pl.BlockSpec((nh, ck), lambda bi, gi, ki: (0, 0)),
        pl.BlockSpec((1, ck), lambda bi, gi, ki: (0, 0)),
        pl.BlockSpec((ck, p2), lambda bi, gi, ki: (0, 0)),
    ]
    out_specs = (
        pl.BlockSpec((None, st, p2), lambda bi, gi, ki, _ns=ns: (bi, gi * _ns + ki, 0)),
        pl.BlockSpec((None, None, 1, p2), lambda bi, gi, ki: (bi, gi, 0, 0)),
    )
    out_shape = (
        jax.ShapeDtypeStruct((b, s, p2), jnp.float32),       # cos (true width)
        jax.ShapeDtypeStruct((b, g, 1, p2), jnp.float32),    # per-split max
    )

    cos_flat, act_part = pl.pallas_call(
        kernel,
        out_shape=out_shape,
        grid_spec=pltpu.PrefetchScalarGridSpec(
            num_scalar_prefetch=0, grid=grid,
            in_specs=in_specs, out_specs=out_specs),
        compiler_params=pltpu.CompilerParams(
            dimension_semantics=("parallel", "parallel", "arbitrary"),
            vmem_limit_bytes=vmem_limit),
    )(att_rows, w12, b12, pn)

    # ---- tiny epilogue: combine spatial splits, last layers, unpack ---------
    act = jnp.max(act_part, axis=(1, 2))                      # (B, 2*NP)
    act_t, act_s = act[:, :num_protos], act[:, num_protos:]
    logits_t = jnp.matmul(act_t, p["last_w_t"], precision=hi)
    logits_s = jnp.matmul(act_s, p["last_w_s"], precision=hi)

    cos_t = cos_flat[:, :, :num_protos].reshape(b, hf, wf, num_protos)
    cos_s = cos_flat[:, :, num_protos:].reshape(b, hf, wf, num_protos)
    if nchw_cos:
        # only for strict PyTorch layout parity; costs a full extra HBM pass
        cos_t = cos_t.transpose(0, 3, 1, 2)
        cos_s = cos_s.transpose(0, 3, 1, 2)
    return (logits_t, logits_s), (act_t, act_s), (cos_t, cos_s)


def make_params(key, proto_dim, num_protos, num_classes):
    ks = jax.random.split(key, 6)
    nh = 6  # DINO ViT-S has 6 heads -> add_on in_channels = 6

    def kaiming(k, fan_in, fan_out):
        # kaiming_normal_(mode='fan_out', relu): std = sqrt(2 / fan_out)
        return (jax.random.normal(k, (fan_in, fan_out), jnp.float32)
                * np.sqrt(2.0 / fan_out)).astype(jnp.float32)

    params = {
        # conv weights stored transposed (Cin, Cout) so the kernel does x @ w
        "w1_t": kaiming(ks[0], nh, proto_dim),
        "b1_t": jnp.zeros((1, proto_dim), jnp.float32),
        "w2_t": kaiming(ks[1], proto_dim, proto_dim),
        "b2_t": jnp.zeros((1, proto_dim), jnp.float32),
        "w1_s": kaiming(ks[2], nh, proto_dim),
        "b1_s": jnp.zeros((1, proto_dim), jnp.float32),
        "w2_s": kaiming(ks[3], proto_dim, proto_dim),
        "b2_s": jnp.zeros((1, proto_dim), jnp.float32),
        # prototype_vectors ~ U[0,1), stored (P, NP) (1x1 spatial squeezed)
        "proto_t": jax.random.uniform(ks[4], (proto_dim, num_protos), jnp.float32),
        "proto_s": jax.random.uniform(ks[5], (proto_dim, num_protos), jnp.float32),
    }
    # last layers: +1 for correct class, -0.5 for incorrect; stored (NP, C)
    npc_per_class = num_protos // num_classes
    class_id = (jnp.arange(num_protos)[:, None] // npc_per_class
                == jnp.arange(num_classes)[None, :]).astype(jnp.float32)
    params["last_w_t"] = class_id * 1.0 + (1.0 - class_id) * (-0.5)
    params["last_w_s"] = params["last_w_t"]
    return params


def ref_forward(att, p):
    """Pure-JAX NCHW reference mirroring the PyTorch math."""
    hi = jax.lax.Precision.HIGHEST
    attn = (att - att.min()) / (att.max() - att.min())

    def branch(w1, b1, w2, b2, proto):
        h = jnp.einsum("bchw,cd->bdhw", attn, w1, precision=hi) + b1.reshape(1, -1, 1, 1)
        h = jnp.einsum("bchw,cd->bdhw", h, w2, precision=hi) + b2.reshape(1, -1, 1, 1)
        xn = h / jnp.maximum(jnp.linalg.norm(h, axis=1, keepdims=True), 1e-12)
        pn = proto / jnp.maximum(jnp.linalg.norm(proto, axis=0, keepdims=True), 1e-12)
        return jnp.maximum(jnp.einsum("bchw,cn->bnhw", xn, pn, precision=hi), 0.0)

    cos_t = branch(p["w1_t"], p["b1_t"], p["w2_t"], p["b2_t"], p["proto_t"])
    cos_s = branch(p["w1_s"], p["b1_s"], p["w2_s"], p["b2_s"], p["proto_s"])
    act_t = cos_t.max(axis=(2, 3))
    act_s = cos_s.max(axis=(2, 3))
    return ((jnp.matmul(act_t, p["last_w_t"], precision=hi),
             jnp.matmul(act_s, p["last_w_s"], precision=hi)),
            (act_t, act_s), (cos_t, cos_s))


def _check(got, ref, rtol=2e-4, atol=2e-4):
    (glt, gls), (gat, gas), (gct, gcs) = got
    (rlt, rls), (rat, ras), (rct, rcs) = ref
    np.testing.assert_allclose(np.asarray(glt), np.asarray(rlt), rtol=rtol, atol=atol)
    np.testing.assert_allclose(np.asarray(gls), np.asarray(rls), rtol=rtol, atol=atol)
    np.testing.assert_allclose(np.asarray(gat), np.asarray(rat), rtol=rtol, atol=atol)
    np.testing.assert_allclose(np.asarray(gas), np.asarray(ras), rtol=rtol, atol=atol)
    # kernel returns NHWC cos maps; reference is NCHW
    np.testing.assert_allclose(np.asarray(gct), np.asarray(rct.transpose(0, 2, 3, 1)),
                               rtol=rtol, atol=atol)
    np.testing.assert_allclose(np.asarray(gcs), np.asarray(rcs.transpose(0, 2, 3, 1)),
                               rtol=rtol, atol=atol)


if __name__ == "__main__":
    key = jax.random.PRNGKey(0)
    k_x, k_mix, k_p, k_x2 = jax.random.split(key, 4)

    # 40 prototypes of dim 32, 4 classes (10 prototypes per class)
    PROTO_DIM, NUM_PROTOS, NUM_CLASSES = 32, 40, 4
    head_mix = jax.random.normal(k_mix, (6, 3), jnp.float32)
    params = make_params(k_p, PROTO_DIM, NUM_PROTOS, NUM_CLASSES)

    # Run 1: batch=2, 32x32 image -> 4x4 attention map; auto tiling (full map
    # in one tile, both batch rows across the parallel axis).
    x = jax.random.normal(k_x, (2, 3, 32, 32), jnp.float32)
    att = get_attention_standin(x, head_mix)                      # (2, 6, 4, 4)
    out = jax.block_until_ready(stprotopnet_forward(att, params))
    _check(out, ref_forward(att, params))

    # Run 2 (path coverage, not a perf default): batch=1, 64x64 image -> 8x8
    # map; 2 parallel spatial splits (keeps both v7x TCs busy at b==1) and an
    # explicit 16-row tile so the resident running-max accumulator is
    # exercised across >1 reduction step.
    x2 = jax.random.normal(k_x2, (1, 3, 64, 64), jnp.float32)
    att2 = get_attention_standin(x2, head_mix)                    # (1, 6, 8, 8)
    out2 = jax.block_until_ready(
        stprotopnet_forward(att2, params, spatial_tile=16, spatial_splits=2))
    _check(out2, ref_forward(att2, params))

    print("KERNEL_OK")
</pallas_src>

<mosaic_0001>
module attributes {stable_mosaic.version = 11 : i64} {
  func.func @stprotopnet_kernel(%arg0: i32, %arg1: i32, %arg2: i32, %arg3: memref<1x16x6xf32, #tpu.memory_space<vmem>>, %arg4: memref<6x128xf32, #tpu.memory_space<vmem>>, %arg5: memref<1x128xf32, #tpu.memory_space<vmem>>, %arg6: memref<128x80xf32, #tpu.memory_space<vmem>>, %arg7: memref<1x16x80xf32, #tpu.memory_space<vmem>>, %arg8: memref<1x1x1x80xf32, #tpu.memory_space<vmem>>) attributes {dimension_semantics = [#tpu.dimension_semantics<parallel>, #tpu.dimension_semantics<parallel>, #tpu.dimension_semantics<arbitrary>], iteration_bounds = array<i64: 2, 1, 1>, scalar_prefetch = 0 : i64, scratch_operands = 0 : i64, tpu.core_type = #tpu.core_type<tc>, window_params = [{transform_indices = @transform_0, window_bounds = array<i64: 1, 16, 6>}, {pipeline_mode = #tpu.pipeline_mode<synchronous>, transform_indices = @transform_1, window_bounds = array<i64: 6, 128>}, {pipeline_mode = #tpu.pipeline_mode<synchronous>, transform_indices = @transform_2, window_bounds = array<i64: 1, 128>}, {pipeline_mode = #tpu.pipeline_mode<synchronous>, transform_indices = @transform_3, window_bounds = array<i64: 128, 80>}, {transform_indices = @transform_4, window_bounds = array<i64: 1, 16, 80>}, {transform_indices = @transform_5, window_bounds = array<i64: 1, 1, 1, 80>}]} {
    %c0 = arith.constant 0 : index
    %c0_0 = arith.constant 0 : index
    %c0_1 = arith.constant 0 : index
    %0 = vector.load %arg3[%c0, %c0_0, %c0_1] : memref<1x16x6xf32, #tpu.memory_space<vmem>>, vector<1x16x6xf32>
    %1 = vector.shape_cast %0 : vector<1x16x6xf32> to vector<16x6xf32>
    %c0_2 = arith.constant 0 : index
    %c0_3 = arith.constant 0 : index
    %2 = vector.load %arg4[%c0_2, %c0_3] : memref<6x128xf32, #tpu.memory_space<vmem>>, vector<6x128xf32>
    %cst = arith.constant dense<0.000000e+00> : vector<16x128xf32>
    %3 = tpu.matmul %1, %2, %cst {dimension_numbers = #tpu.dot_dimension_numbers<[1], [0], [0], [1], [0, 0, 1, 1], [], []>} : vector<16x6xf32>, vector<6x128xf32>, vector<16x128xf32> -> vector<16x128xf32>
    %c0_4 = arith.constant 0 : index
    %c0_5 = arith.constant 0 : index
    %4 = vector.load %arg5[%c0_4, %c0_5] : memref<1x128xf32, #tpu.memory_space<vmem>>, vector<1x128xf32>
    %5 = vector.broadcast %4 : vector<1x128xf32> to vector<16x128xf32>
    %6 = arith.addf %3, %5 : vector<16x128xf32>
    %7 = tpu.iota {dimensions = array<i32: 1>} : vector<16x128xi32>
    %c32_i32 = arith.constant 32 : i32
    %8 = vector.broadcast %c32_i32 : i32 to vector<16x128xi32>
    %9 = arith.cmpi slt, %7, %8 : vector<16x128xi32>
    %10 = arith.mulf %6, %6 : vector<16x128xf32>
    %cst_6 = arith.constant 0.000000e+00 : f32
    %11 = vector.broadcast %cst_6 : f32 to vector<16x128xf32>
    %12 = arith.select %9, %10, %11 : vector<16x128xi1>, vector<16x128xf32>
    %cst_7 = arith.constant dense<0.000000e+00> : vector<16xf32>
    %13 = vector.multi_reduction <add>, %12, %cst_7 [1] : vector<16x128xf32> to vector<16xf32>
    %14 = vector.shape_cast %13 : vector<16xf32> to vector<16x1xf32>
    %cst_8 = arith.constant 0.000000e+00 : f32
    %15 = vector.broadcast %cst_8 : f32 to vector<16x128xf32>
    %16 = arith.select %9, %15, %10 : vector<16x128xi1>, vector<16x128xf32>
    %cst_9 = arith.constant dense<0.000000e+00> : vector<16xf32>
    %17 = vector.multi_reduction <add>, %16, %cst_9 [1] : vector<16x128xf32> to vector<16xf32>
    %18 = vector.shape_cast %17 : vector<16xf32> to vector<16x1xf32>
    %cst_10 = arith.constant 1.000000e-24 : f32
    %19 = vector.broadcast %cst_10 : f32 to vector<16x1xf32>
    %20 = arith.maximumf %14, %19 : vector<16x1xf32>
    %21 = math.rsqrt %20 : vector<16x1xf32>
    %cst_11 = arith.constant 1.000000e-24 : f32
    %22 = vector.broadcast %cst_11 : f32 to vector<16x1xf32>
    %23 = arith.maximumf %18, %22 : vector<16x1xf32>
    %24 = math.rsqrt %23 : vector<16x1xf32>
    %25 = vector.shape_cast %21 : vector<16x1xf32> to vector<16x1xf32>
    %26 = vector.broadcast %25 : vector<16x1xf32> to vector<16x128xf32>
    %27 = vector.shape_cast %24 : vector<16x1xf32> to vector<16x1xf32>
    %28 = vector.broadcast %27 : vector<16x1xf32> to vector<16x128xf32>
    %29 = arith.select %9, %26, %28 : vector<16x128xi1>, vector<16x128xf32>
    %30 = arith.mulf %6, %29 : vector<16x128xf32>
    %c0_12 = arith.constant 0 : index
    %c0_13 = arith.constant 0 : index
    %31 = vector.load %arg6[%c0_12, %c0_13] : memref<128x80xf32, #tpu.memory_space<vmem>>, vector<128x80xf32>
    %cst_14 = arith.constant dense<0.000000e+00> : vector<16x80xf32>
    %32 = tpu.matmul %30, %31, %cst_14 {dimension_numbers = #tpu.dot_dimension_numbers<[1], [0], [0], [1], [0, 0, 1, 1], [], []>} : vector<16x128xf32>, vector<128x80xf32>, vector<16x80xf32> -> vector<16x80xf32>
    %cst_15 = arith.constant 0.000000e+00 : f32
    %33 = vector.broadcast %cst_15 : f32 to vector<16x80xf32>
    %34 = arith.maximumf %32, %33 : vector<16x80xf32>
    %c0_16 = arith.constant 0 : index
    %c0_17 = arith.constant 0 : index
    %c0_18 = arith.constant 0 : index
    %35 = vector.load %arg7[%c0_16, %c0_17, %c0_18] : memref<1x16x80xf32, #tpu.memory_space<vmem>>, vector<1x16x80xf32>
    %36 = vector.shape_cast %35 : vector<1x16x80xf32> to vector<16x80xf32>
    %37 = vector.shape_cast %34 : vector<16x80xf32> to vector<1x16x80xf32>
    tpu.vector_store %arg7[%c0_16, %c0_17, %c0_18], %37 {strides = array<i32>} : memref<1x16x80xf32, #tpu.memory_space<vmem>>, vector<1x16x80xf32>,
    %cst_19 = arith.constant dense<0xFF800000> : vector<80xf32>
    %38 = vector.multi_reduction <maximumf>, %34, %cst_19 [0] : vector<16x80xf32> to vector<80xf32>
    %39 = vector.shape_cast %38 : vector<80xf32> to vector<1x80xf32>
    %c0_i32 = arith.constant 0 : i32
    %40 = arith.cmpi eq, %arg2, %c0_i32 : i32
    %41 = arith.extui %40 : i1 to i32
    %c0_i32_20 = arith.constant 0 : i32
    %42 = arith.cmpi ne, %41, %c0_i32_20 : i32
    scf.if %42 {
      %c0_23 = arith.constant 0 : index
      %c0_24 = arith.constant 0 : index
      %c0_25 = arith.constant 0 : index
      %c0_26 = arith.constant 0 : index
      %46 = vector.load %arg8[%c0_23, %c0_24, %c0_25, %c0_26] : memref<1x1x1x80xf32, #tpu.memory_space<vmem>>, vector<1x1x1x80xf32>
      %47 = vector.shape_cast %46 : vector<1x1x1x80xf32> to vector<1x80xf32>
      %48 = vector.shape_cast %39 : vector<1x80xf32> to vector<1x1x1x80xf32>
      tpu.vector_store %arg8[%c0_23, %c0_24, %c0_25, %c0_26], %48 {strides = array<i32>} : memref<1x1x1x80xf32, #tpu.memory_space<vmem>>, vector<1x1x1x80xf32>,
    } else {
    }
    %c0_i32_21 = arith.constant 0 : i32
    %43 = arith.cmpi sgt, %arg2, %c0_i32_21 : i32
    %44 = arith.extui %43 : i1 to i32
    %c0_i32_22 = arith.constant 0 : i32
    %45 = arith.cmpi ne, %44, %c0_i32_22 : i32
    scf.if %45 {
      %c0_23 = arith.constant 0 : index
      %c0_24 = arith.constant 0 : index
      %c0_25 = arith.constant 0 : index
      %c0_26 = arith.constant 0 : index
      %46 = vector.load %arg8[%c0_23, %c0_24, %c0_25, %c0_26] : memref<1x1x1x80xf32, #tpu.memory_space<vmem>>, vector<1x1x1x80xf32>
      %47 = vector.shape_cast %46 : vector<1x1x1x80xf32> to vector<1x80xf32>
      %48 = arith.maximumf %47, %39 : vector<1x80xf32>
      %c0_27 = arith.constant 0 : index
      %c0_28 = arith.constant 0 : index
      %c0_29 = arith.constant 0 : index
      %c0_30 = arith.constant 0 : index
      %49 = vector.load %arg8[%c0_27, %c0_28, %c0_29, %c0_30] : memref<1x1x1x80xf32, #tpu.memory_space<vmem>>, vector<1x1x1x80xf32>
      %50 = vector.shape_cast %49 : vector<1x1x1x80xf32> to vector<1x80xf32>
      %51 = vector.shape_cast %48 : vector<1x80xf32> to vector<1x1x1x80xf32>
      tpu.vector_store %arg8[%c0_27, %c0_28, %c0_29, %c0_30], %51 {strides = array<i32>} : memref<1x1x1x80xf32, #tpu.memory_space<vmem>>, vector<1x1x1x80xf32>,
    } else {
    }
    return
  }
  func.func @transform_0(%arg0: i32, %arg1: i32, %arg2: i32) -> (i32, i32, i32) {
    %c1_i32 = arith.constant 1 : i32
    %0 = arith.muli %arg1, %c1_i32 : i32
    %1 = arith.addi %0, %arg2 : i32
    %c0_i32 = arith.constant 0 : i32
    %c0_i32_0 = arith.constant 0 : i32
    return %arg0, %1, %c0_i32 : i32, i32, i32
  }
  func.func @transform_1(%arg0: i32, %arg1: i32, %arg2: i32) -> (i32, i32) {
    %c0_i32 = arith.constant 0 : i32
    %c0_i32_0 = arith.constant 0 : i32
    %c0_i32_1 = arith.constant 0 : i32
    return %c0_i32, %c0_i32_0 : i32, i32
  }
  func.func @transform_2(%arg0: i32, %arg1: i32, %arg2: i32) -> (i32, i32) {
    %c0_i32 = arith.constant 0 : i32
    %c0_i32_0 = arith.constant 0 : i32
    %c0_i32_1 = arith.constant 0 : i32
    return %c0_i32, %c0_i32_0 : i32, i32
  }
  func.func @transform_3(%arg0: i32, %arg1: i32, %arg2: i32) -> (i32, i32) {
    %c0_i32 = arith.constant 0 : i32
    %c0_i32_0 = arith.constant 0 : i32
    %c0_i32_1 = arith.constant 0 : i32
    return %c0_i32, %c0_i32_0 : i32, i32
  }
  func.func @transform_4(%arg0: i32, %arg1: i32, %arg2: i32) -> (i32, i32, i32) {
    %c1_i32 = arith.constant 1 : i32
    %0 = arith.muli %arg1, %c1_i32 : i32
    %1 = arith.addi %0, %arg2 : i32
    %c0_i32 = arith.constant 0 : i32
    %c0_i32_0 = arith.constant 0 : i32
    return %arg0, %1, %c0_i32 : i32, i32, i32
  }
  func.func @transform_5(%arg0: i32, %arg1: i32, %arg2: i32) -> (i32, i32, i32, i32) {
    %c0_i32 = arith.constant 0 : i32
    %c0_i32_0 = arith.constant 0 : i32
    %c0_i32_1 = arith.constant 0 : i32
    return %arg0, %arg1, %c0_i32, %c0_i32_0 : i32, i32, i32, i32
  }
}

</mosaic_0001>

<bundles_post_ra>
// kernel: tpu_custom_call.1
= control target key start
LH: loop header
LB: loop body
LE: loop exit
PB: predicated region body
PF: predicated region fallthrough
CT: control target
= control target key end

     0   :  { %11 = vsyncpa [#allocation3], 0  ;;  %s1050_s0 = inlined_call_operand.vmem [shape: f32[2,16,6], index: 0, kind: input, shape index: {}]   ;;  %s1051_s1 = inlined_call_operand.vmem [shape: f32[6,128], index: 1, kind: input, shape index: {}]   ;;  %s1052_s2 = inlined_call_operand.vmem [shape: f32[1,128], index: 2, kind: input, shape index: {}]   ;;  %s1053_s3 = inlined_call_operand.vmem [shape: f32[128,80], index: 3, kind: input, shape index: {}]   ;;  %s1054_s4 = inlined_call_operand.hbm [shape: f32[2,16,80], index: 4, kind: output, shape index: {0}]   ;;  %s1055_s5 = inlined_call_operand.hbm [shape: f32[2,1,1,80], index: 5, kind: output, shape index: {1}]  }
   0x1   :  { %13 = vsyncpa [#allocation3 + $0x1], 0 }
   0x2   :  { %14 = vsyncpa [#allocation5], 0 }
   0x3   :  { %16 = vsyncpa [#allocation5 + $0x1], 0  ;;  %s854_s18 = smov 0   ;;  %s856_s19 = smov 0  }
   0x4   :  { %s858_s20 = smov 0   ;;  %s860_s21 = smov 0  }
   0x5   :  { %s862_s22 = smov 0   ;;  %s864_s23 = smov 0  }
   0x6 LB: > { %s605_s24 = sadd.s32 4294967295, %s820_s23   ;;  %s606_s25 = sadd.s32 4294967294, %s820_s23   ;;  %s820_s23 = sphi %s864_s23, %s22_s23   ;;  %s816_s22 = sphi %s862_s22, %s1062_s22   ;;  %s812_s21 = sphi %s860_s21, %s1061_s21   ;;  %s808_s20 = sphi %s858_s20, %s1060_s20   ;;  %s804_s19 = sphi %s856_s19, %s1059_s19   ;;  %s800_s18 = sphi %s854_s18, %s1058_s18  }
   0x7   : > { %s41_s26 = sadd.s32 1, %s816_s22  ;;  %s145_s27 = sadd.s32 1, %s808_s20 }
   0x8   : > { %p43_p0 = scmp.ge.s32.totalorder %s41_s26, 2  ;;  %p155_p1 = scmp.ne.s32.totalorder %s808_s20, %s804_s19 }
   0x9   : > { %p156_p2 = scmp.eq.s32.totalorder %s605_s24, 1  ;;  %p161_p3 = scmp.ne.s32.totalorder %s804_s19, %s800_s18 }
   0xa   : > { %s1064_s26 = smov (%p43_p0, %s41_s26), 0  ;;  %p162_p5 = scmp.eq.s32.totalorder %s606_s25, 1 }
   0xb   : > { %p894_p4 = por %p156_p2, %p155_p1  ;;  %s140_s29 = ssub.s32 %s816_s22, %s1064_s26 }
   0xc   : > { %p609_p6 = scmp.ge.s32.totalorder %s820_s23, 1  ;;  %p143_p7 = scmp.eq.s32.totalorder %s140_s29, 0 }
   0xd   : > { %p901_p8 = por %p162_p5, %p161_p3  ;;  %p232_p9 = scmp.lt.s32.totalorder %s820_s23, 3 }
   0xe   : > { %s907_s6 = scalar_select %p143_p7, %s808_s20, %s145_s27  }
   0xf   : > { %p233_p10 = pnand %p609_p6, %p232_p9 }
  0x10   : > { %p271_p11 = scmp.lt.s32.totalorder (!%p233_p10), %s812_s21, 1  ;;  %s994_s24 = sand.u32 (!%p233_p10), 1, %s804_s19  }
  0x11   : > { %236 = sbr.rel (%p233_p10) target bundleno = 466 (0x1d2), region = 36  ;;  %s610_s25 = sshll.u32 (!%p233_p10), %s994_s24, 4 }
  0x12   : > { %s262_s27 = scalar_lea.vmem (!%p233_p10), [#allocation2], %s610_s25  ;;  %s622_s29 = sshll.u32 (!%p233_p10), %s812_s21, 4 }
  0x13   : > { %s457_s12 = scalar_lea.sflag (!%p233_p10), [#allocation3], %s994_s24  ;;  %s730_s17 = scalar_lea.hbm (!%p233_p10), %s1054_s4, 32 }
  0x16   : > { %v285_v0 = vld [vmem:[%s1051_s1] sm:$0x3f]  ;;  %vm297_vm0 = vcmask 1045504   ;;  %s272_s9 = scalar_select %p271_p11, %s812_s21, 1  ;;  %vm290_vm1 = vcmask 48128   ;;  %v324_v3 = vlaneseq  ;;  %v404_v16 = vld [vmem:[%s1053_s3 + $0x78] sm:$0xff] }
  0x17   : > { %613 = vmatpush.msk.msra.mxu0 %vm297_vm0, %v285_v0  ;;  %v701_v4 = vld [vmem:[%s1052_s2] ss:$0 sm:$0xff]  ;;  %405 = vmatpush.msra.mxu1 %v404_v16  ;;  %v403_v17 = vld [vmem:[%s1053_s3 + $0x70] sm:$0xff]  ;;  %v402_v18 = vld [vmem:[%s1053_s3 + $0x68] sm:$0xff]  ;;  %vm430_vm15 = vcmask 654336  }
  0x18   : > { %s621_s10 = sshll.u32 %s272_s9, 4  ;;  %v920_v5 = vand.u32 127, %v324_v3  ;;  %623 = vmatpush.msra.mxu2 %v404_v16  ;;  %v401_v19 = vld [vmem:[%s1053_s3 + $0x60] sm:$0xff]  ;;  %v400_v20 = vld [vmem:[%s1053_s3 + $0x58] sm:$0xff]  ;;  %v399_v21 = vld [vmem:[%s1053_s3 + $0x50] sm:$0xff]  ;;  %s475_s9 = scalar_lea.hbm %s1054_s4, %s622_s29 }
  0x19   : > { %s278_s13 = scalar_lea.vmem %s1050_s0, %s621_s10  ;;  %406 = vmatpush.msra.mxu1 %v403_v17  ;;  %v398_v22 = vld [vmem:[%s1053_s3 + $0x48] sm:$0xff]  ;;  %v397_v23 = vld [vmem:[%s1053_s3 + $0x40] sm:$0xff]  ;;  %v396_v24 = vld [vmem:[%s1053_s3 + $0x38] sm:$0xff]  ;;  %s476_s10 = sshll.u32 %s262_s27, 4  ;;  %s477_s10 = int_to_ptr.vmem [resolvable:$true] %s476_s10 }
  0x1a   : > { %v283_v1 = vld [vmem:[%s278_s13] sm:$0xff]  ;;  %v284_v2 = vld [vmem:[%s278_s13 + $0x8] sm:$0xff]  ;;  %vm326_vm2 = vcmp.lt.s32.totalorder %v920_v5, 32  ;;  %624 = vmatpush.msra.mxu2 %v403_v17  ;;  %v395_v25 = vld [vmem:[%s1053_s3 + $0x30] sm:$0xff]  ;;  %s478_s11 = sshll.u32 %s475_s9, 4  ;;  %s479_s11 = int_to_ptr.hbm [resolvable:$true] %s478_s11 }
  0x1b   : > { %614 = vmatmul.msk.f32.vlgmr.msra.gmra.mxu0 %vm290_vm1, %v283_v1  ;;  %407 = vmatpush.msra.mxu1 %v402_v18  ;;  %v394_v26 = vld [vmem:[%s1053_s3 + $0x28] sm:$0xff]  ;;  %v393_v27 = vld [vmem:[%s1053_s3 + $0x20] sm:$0xff]  ;;  %v392_v28 = vld [vmem:[%s1053_s3 + $0x18] sm:$0xff]  ;;  %s724_s13 = sshra.s32 %s479_s11, 4  ;;  %s725_s13 = int_to_ptr.hbm [resolvable:$true] %s724_s13 }
  0x1c   : > { %625 = vmatpush.msra.mxu2 %v402_v18  ;;  %v391_v29 = vld [vmem:[%s1053_s3 + $0x10] sm:$0xff]  ;;  %v390_v30 = vld [vmem:[%s1053_s3 + $0x8] sm:$0xff]  ;;  %v389_v31 = vld [vmem:[%s1053_s3] sm:$0xff]  ;;  %s726_s14 = scalar_lea.hbm %s725_s13, 16  ;;  %p731_p1 = scmp.lt.s32.totalorder %s725_s13, %s1054_s4 }
  0x1d   : > { %408 = vmatpush.msra.mxu1 %v401_v19  ;;  %p727_p12 = scmp.ne.s32.totalorder %s725_s13, %s726_s14  ;;  %p732_p2 = scmp.lt.s32.totalorder %s730_s17, %s726_s14 }
  0x1e   : > { %626 = vmatpush.msra.mxu2 %v401_v19 }
  0x1f   : > { %409 = vmatpush.msra.mxu1 %v400_v20  ;;  %p728_p13 = pnand %p727_p12, %p894_p4  ;;  %p733_p3 = por %p732_p2, %p731_p1 }
  0x20   : > { %627 = vmatpush.msra.mxu2 %v400_v20 }
  0x21   : > { %410 = vmatpush.msra.mxu1 %v399_v21  ;;  %p729_p0 = pneg %p728_p13 }
  0x22   : > { %628 = vmatpush.msra.mxu2 %v399_v21 }
  0x23   : > { %615 = vmatmul.msk.f32.gmra.mxu0 %vm290_vm1, %v284_v2  ;;  %411 = vmatpush.msra.mxu1 %v398_v22  ;;  %p734_p5 = pnand %p733_p3, %p729_p0 }
  0x24   : > { %629 = vmatpush.msra.mxu2 %v398_v22 }
  0x25   : > { %412 = vmatpush.msra.mxu1 %v397_v23 }
  0x26   : > { %630 = vmatpush.msra.mxu2 %v397_v23 }
  0x27   : > { %413 = vmatpush.msra.mxu1 %v396_v24 }
  0x28   : > { %631 = vmatpush.msra.mxu2 %v396_v24 }
  0x29   : > { %414 = vmatpush.msra.mxu1 %v395_v25 }
  0x2a   : > { %632 = vmatpush.msra.mxu2 %v395_v25 }
  0x2b   : > { %415 = vmatpush.msra.mxu1 %v394_v26 }
  0x2c   : > { %633 = vmatpush.msra.mxu2 %v394_v26 }
  0x2d   : > { %416 = vmatpush.msra.mxu1 %v393_v27 }
  0x2e   : > { %634 = vmatpush.msra.mxu2 %v393_v27 }
  0x2f   : > { %417 = vmatpush.msra.mxu1 %v392_v28 }
  0x30   : > { %635 = vmatpush.msra.mxu2 %v392_v28 }
  0x31   : > { %418 = vmatpush.msra.mxu1 %v391_v29 }
  0x32   : > { %636 = vmatpush.msra.mxu2 %v391_v29 }
  0x33   : > { %419 = vmatpush.msra.mxu1 %v390_v30 }
  0x34   : > { %637 = vmatpush.msra.mxu2 %v390_v30 }
  0x35   : > { %420 = vmatpush.msra.mxu1 %v389_v31 }
  0x36   : > { %638 = vmatpush.msra.mxu2 %v389_v31 }
  0x98   : > { %v318_v6 = vpop.f32.mrf.mxu0 }
  0x99   : > { %v922_v7 = vadd.f32 %v701_v4, %v318_v6 }
  0x9b   : > { %v327_v8 = vmul.f32 %v922_v7, %v922_v7 }
  0x9d   : > { %v329_v9 = vsel %vm326_vm2, %v327_v8, 0.0  ;;  %v335_v14 = vsel %vm326_vm2, 0.0, %v327_v8 }
  0x9e   : > { %331 = vadd.xlane.f32.xlu1 %v329_v9 }
  0xa0   : > { %v321_v10 = vpop.f32.mrf.mxu0 }
  0xa1   : > { %v929_v11 = vadd.f32 %v701_v4, %v321_v10 }
  0xa3   : > { %v328_v12 = vmul.f32 %v929_v11, %v929_v11 }
  0xa5   : > { %v330_v13 = vsel %vm326_vm2, %v328_v12, 0.0  ;;  %v336_v15 = vsel %vm326_vm2, 0.0, %v328_v12 }
  0xa6   : > { %333 = vadd.xlane.f32.xlu0 %v330_v13  ;;  %337 = vadd.xlane.f32.xlu1 %v335_v14 }
  0xae   : > { %339 = vadd.xlane.f32.xlu0 %v336_v15 }
 0x111   : > { %v332_v32 = vpop.xlane.xlu1 %331 }
 0x112   : > { %v341_v33 = vmax.f32 %v332_v32, 1e-24 }
 0x114   : > { %702 = vrsqrt.f32 %v341_v33  ;;  %vm349_vm5 = vweird.f32 %v341_v33 }
 0x119   : > { %v334_v34 = vpop.xlane.xlu0 %333  ;;  %v338_v35 = vpop.xlane.xlu1 %337 }
 0x11a   : > { %v703_v36 = vpop.eup %702  ;;  %v342_v37 = vmax.f32 %v334_v34, 1e-24  ;;  %v363_v38 = vmax.f32 %v338_v35, 1e-24 }
 0x11b   : > { %v344_v39 = vmul.f32 %v703_v36, %v341_v33  ;;  %vm350_vm3 = vweird.f32 %v703_v36 }
 0x11c   : > { %704 = vrsqrt.f32 %v342_v37  ;;  %vm351_vm6 = vmor %vm349_vm5, %vm350_vm3  ;;  %vm371_vm7 = vweird.f32 %v363_v38  ;;  %vm359_vm11 = vweird.f32 %v342_v37 }
 0x11d   : > { %706 = vrsqrt.f32 %v363_v38  ;;  %v345_v40 = vmul.f32 %v703_v36, %v344_v39 }
 0x11f   : > { %v346_v43 = vmul.f32 0.5, %v345_v40 }
 0x121   : > { %v340_v41 = vpop.xlane.xlu0 %339  ;;  %v347_v49 = vsub.f32 1.5, %v346_v43 }
 0x122   : > { %v705_v42 = vpop.eup %704  ;;  %v364_v44 = vmax.f32 %v340_v41, 1e-24 }
 0x123   : > { %v707_v45 = vpop.eup %706  ;;  %v354_v46 = vmul.f32 %v705_v42, %v342_v37  ;;  %v348_v55 = vmul.f32 %v703_v36, %v347_v49  ;;  %vm360_vm9 = vweird.f32 %v705_v42 }
 0x124   : > { %v366_v47 = vmul.f32 %v707_v45, %v363_v38  ;;  %708 = vrsqrt.f32 %v364_v44  ;;  %vm372_vm4 = vweird.f32 %v707_v45  ;;  %vm361_vm12 = vmor %vm359_vm11, %vm360_vm9  ;;  %vm381_vm13 = vweird.f32 %v364_v44 }
 0x125   : > { %v355_v48 = vmul.f32 %v705_v42, %v354_v46  ;;  %vm373_vm8 = vmor %vm371_vm7, %vm372_vm4  ;;  %v352_v60 = vsel %vm351_vm6, %v703_v36, %v348_v55 }
 0x126   : > { %v367_v50 = vmul.f32 %v707_v45, %v366_v47 }
 0x127   : > { %v356_v52 = vmul.f32 0.5, %v355_v48 }
 0x128   : > { %v368_v51 = vmul.f32 0.5, %v367_v50 }
 0x129   : > { %v357_v58 = vsub.f32 1.5, %v356_v52 }
 0x12a   : > { %v709_v53 = vpop.eup %708  ;;  %v369_v54 = vsub.f32 1.5, %v368_v51 }
 0x12b   : > { %v376_v56 = vmul.f32 %v709_v53, %v364_v44  ;;  %vm382_vm10 = vweird.f32 %v709_v53  ;;  %v358_v2 = vmul.f32 %v705_v42, %v357_v58 }
 0x12c   : > { %v370_v57 = vmul.f32 %v707_v45, %v369_v54  ;;  %vm383_vm14 = vmor %vm381_vm13, %vm382_vm10 }
 0x12d   : > { %v377_v59 = vmul.f32 %v709_v53, %v376_v56  ;;  %v362_v4 = vsel %vm361_vm12, %v705_v42, %v358_v2 }
 0x12e   : > { %v374_v61 = vsel %vm373_vm8, %v707_v45, %v370_v57 }
 0x12f   : > { %v378_v62 = vmul.f32 0.5, %v377_v59  ;;  %v385_v63 = vsel %vm326_vm2, %v352_v60, %v374_v61 }
 0x130   : > { %v387_v0 = vmul.f32 %v385_v63, %v922_v7 }
 0x131   : > { %v379_v1 = vsub.f32 1.5, %v378_v62 }
 0x132   : > { %421 = vmatmul.f32.vlgmr.msra.gmra.mxu1 %v387_v0 }
 0x133   : > { %v380_v3 = vmul.f32 %v709_v53, %v379_v1 }
 0x135   : > { %v384_v6 = vsel %vm383_vm14, %v709_v53, %v380_v3 }
 0x136   : > { %v386_v8 = vsel %vm326_vm2, %v362_v4, %v384_v6 }
 0x137   : > { %v388_v9 = vmul.f32 %v386_v8, %v929_v11 }
 0x139   : > { %424 = vmatmul.f32.vlgmr.msra.gmra.mxu2 %v388_v9 }
 0x1af   : > { %v422_v7 = vpop.f32.mrf.mxu1 }
 0x1b0   : > { %v428_v10 = vmax.f32 %v422_v7, 0.0 }
 0x1b2   : > { %431 = vst.msk [vmem:[%s262_s27] sm:$0xff] %vm430_vm15, %v428_v10  ;;  %v433_v12 = vsel %vm430_vm15, %v428_v10, -inf }
 0x1bc   : > { %v425_v5 = vpop.f32.mrf.mxu2 }
 0x1bd   : > { %v429_v11 = vmax.f32 %v425_v5, 0.0 }
 0x1bf   : > { %432 = vst.msk [vmem:[%s262_s27 + $0x8] sm:$0xff] %vm430_vm15, %v429_v11  ;;  %v434_v13 = vsel %vm430_vm15, %v429_v11, -inf }
 0x1c0   : > { %v435_v14 = vmax.f32 %v433_v12, %v434_v13 }
 0x1c1   : > { %737 = shalt.err (!%p734_p5)
}
 0x1c2   : > { %s822_s27 = smov 128   ;;  %s823_s7 = smov 8   ;;  %v436_v15 = vrot.slane %v435_v14, 4  ;;  %vm446_vm0 = vcmask 647168  }
 0x1c3   : > { %639 = dma.vmem_to_hbm [thread:$0]  (%p894_p4), %s477_s10, 256, %s479_s11, %s457_s12, %s822_s27, %s822_s27, %s823_s7  }
 0x1c4   : > { %v437_v16 = vmax.f32 %v435_v14, %v436_v15  ;;  %s491_s15 = scalar_lea.hbm %s1055_s5, %s812_s21  ;;  %s268_s13 = scalar_lea.vmem [#allocation4], %s994_s24 }
 0x1c5   : > { %s493_s14 = sshll.u32 %s268_s13, 4  ;;  %s495_s16 = sshll.u32 %s491_s15, 4  ;;  %s494_s14 = int_to_ptr.vmem [resolvable:$true] %s493_s14  ;;  %s496_s16 = int_to_ptr.hbm [resolvable:$true] %s495_s16 }
 0x1c6   : > { %v438_v17 = vrot.slane %v437_v16, 2  ;;  %s462_s17 = scalar_lea.sflag [#allocation5], %s994_s24  ;;  %s752_s10 = sshra.s32 %s496_s16, 4  ;;  %s753_s10 = int_to_ptr.hbm [resolvable:$true] %s752_s10 }
 0x1c7   : > { %s754_s11 = scalar_lea.hbm %s753_s10, 1  ;;  %s758_s25 = scalar_lea.hbm %s1055_s5, 2 }
 0x1c8   : > { %v439_v18 = vmax.f32 %v437_v16, %v438_v17  ;;  %p755_p6 = scmp.ne.s32.totalorder %s753_s10, %s754_s11  ;;  %p759_p10 = scmp.lt.s32.totalorder %s753_s10, %s1055_s5 }
 0x1c9   : > { %p760_p11 = scmp.lt.s32.totalorder %s758_s25, %s754_s11 }
 0x1ca   : > { %v440_v19 = vrot.slane %v439_v18, 1  ;;  %p756_p7 = pnand %p755_p6, %p894_p4 }
 0x1cb   : > { %p761_p12 = por %p760_p11, %p759_p10 }
 0x1cc   : > { %v441_v20 = vmax.f32 %v439_v18, %v440_v19  ;;  %p757_p9 = pneg %p756_p7 }
 0x1ce   : > { %447 = vst.msk [vmem:[%s268_s13] sm:$0x1] %vm446_vm0, %v441_v20  ;;  %p762_p13 = pnand %p761_p12, %p757_p9 }
 0x1d0   : > { %765 = shalt.err (!%p762_p13)
}
 0x1d1   : > { %640 = dma.vmem_to_hbm [thread:$0]  (%p894_p4), %s494_s14, 16, %s496_s16, %s462_s17  }
 0x1d2 PF: > { %p650_p0 = scmp.ge.s32.totalorder %s820_s23, 2  ;;  %s507_s24 = sand.u32 1, %s800_s18  }
 0x1d3   : > { %s508_s7 = scalar_lea.sflag [#allocation3], %s507_s24 }
 0x1d4   : > { %p644_p1 = pnand %p650_p0, %p901_p8 }
 0x1d6   : > { %p645_p2 = pneg %p644_p1 }
 0x1d8   : > { %791 = dma.done.wait (%p645_p2), %s508_s7, 256  }
 0x1d9   : > { %793 = vsyncadd (%p645_p2), %s508_s7, 4294967040  ;;  %s518_s8 = scalar_lea.sflag [#allocation5], %s507_s24 }
 0x1da   : > { %795 = dma.done.wait (%p645_p2), %s518_s8, 16  }
 0x1db   : > { %797 = vsyncadd (%p645_p2), %s518_s8, 4294967280  ;;  %s22_s23 = sadd.s32 1, %s820_s23   ;;  %s1058_s18 = smov %s804_s19 }
 0x1dc   : > { %p19_p3 = scmp.ge.s32.totalorder %s22_s23, 4   ;;  %s1059_s19 = smov %s808_s20 }
 0x1dd   : > { %s1060_s20 = smov %s907_s6  ;;  %s1061_s21 = smov %s816_s22 }
 0x1de   : > { %s1062_s22 = smov %s1064_s26  ;;  %21 = sbr.rel (!%p19_p3) target bundleno = 6 (0x6), region = 96 }
 0x1e3   :  { %523 = vsyncpa [#allocation3], 1 }
 0x1e4   :  { %525 = vsyncpa [#allocation3 + $0x1], 1 }
 0x1e5   :  { %526 = vsyncpa [#allocation5], 1 }
 0x1e6   :  { %528 = vsyncpa [#allocation5 + $0x1], 1 }

</bundles_post_ra>
